<compile_context>
chip_gen: v7x
topology: tpu7x:2x2x1
jax: 0.10.0
libtpu: 0.0.40
codegen_flags: <defaults>
</compile_context>

<pallas_src>
import math

import jax
import jax.numpy as jnp
from jax.experimental import pallas as pl
from jax.experimental.pallas import tpu as pltpu


# ----------------------------------------------------------------------------
# Kernel
# ----------------------------------------------------------------------------
def _make_pad_trunc_kernel(keep_w: int, in_w: int, out_w: int):
    """Kernel over flattened blocks: x (TB, in_w) -> out (TB, out_w).

    keep_w = min(L, max_len) * D  (static), in_w = L * D, out_w = max_len * D.
    Copies columns [0, keep_w) and zero-fills [keep_w, out_w) (if any).
    """

    def kernel(x_ref, o_ref):
        # Kept prefix: full-block read in the pad case, VMEM slice in the
        # truncation case (the HBM->VMEM DMA already brought the whole row in).
        if keep_w == in_w:
            src = x_ref[...]
        else:
            src = x_ref[:, pl.ds(0, keep_w)]
        src = src.astype(o_ref.dtype)

        if keep_w == out_w:
            # Truncation (or exact length): single full-block, lane-dense store.
            o_ref[...] = src
        else:
            # Padding: store kept prefix once, zero only the tail.
            o_ref[:, pl.ds(0, keep_w)] = src
            pad_w = out_w - keep_w
            o_ref[:, pl.ds(keep_w, pad_w)] = jnp.zeros(
                (o_ref.shape[0], pad_w), dtype=o_ref.dtype
            )

    return kernel


# ----------------------------------------------------------------------------
# Batch-tile selection
# ----------------------------------------------------------------------------
def _choose_tb(B: int, in_w: int, out_w: int, in_bytes: int,
               target_bytes: int = 2 << 20) -> int:
    """Pick a batch tile TB (divides B; multiple of 8 or == B) targeting
    ~1-2 MiB combined (in+out) block bytes. Conservative enough for v7x's
    smaller VMEM (double-buffered in+out stays well under the scoped limit)."""
    per_row = in_w * in_bytes + out_w * 4  # output is f32
    tb_cap = max(1, target_bytes // max(per_row, 1))
    if B >= 16:
        # Prefer >= 2 grid steps so the "parallel" axis can shard across TCs.
        tb_cap = min(tb_cap, B // 2)
    if tb_cap >= B:
        return B
    # Largest multiple-of-8 divisor of B that fits the cap (sublane constraint).
    cand = (tb_cap // 8) * 8
    while cand >= 8:
        if B % cand == 0:
            return cand
        cand -= 8
    # No suitable divisor: fall back to the whole batch in one block.
    # TODO(synk): for huge B with awkward factors, pad B to a multiple of 8.
    return B


# ----------------------------------------------------------------------------
# Wrappers
# ----------------------------------------------------------------------------
def pad_trunc_seq_batch(x, max_len: int = 50):
    """Batched pad/truncate: x (B, L, D) -> ((B, max_len, D) f32, (B, max_len) bool).

    All sequences share the same static length L (mask/padding are identical
    per example).
    """
    B, length, d = x.shape
    l_keep = min(length, max_len)
    in_w = length * d
    keep_w = l_keep * d
    out_w = max_len * d

    # Contiguous flatten of (L, D) -> L*D: metadata-only, gives a lane-dense
    # last dimension for both input loads and output stores.
    x_flat = x.reshape(B, in_w)

    tb = _choose_tb(B, in_w, out_w, x.dtype.itemsize)
    grid = (B // tb,)

    out_flat = pl.pallas_call(
        _make_pad_trunc_kernel(keep_w, in_w, out_w),
        out_shape=jax.ShapeDtypeStruct((B, out_w), jnp.float32),
        grid_spec=pltpu.PrefetchScalarGridSpec(
            num_scalar_prefetch=0,
            grid=grid,
            in_specs=[pl.BlockSpec((tb, in_w), lambda b: (b, 0))],
            out_specs=pl.BlockSpec((tb, out_w), lambda b: (b, 0)),
        ),
        compiler_params=pltpu.CompilerParams(
            dimension_semantics=("parallel",),
        ),
    )(x_flat)

    x_new = out_flat.reshape(B, max_len, d)
    # Padding mask is a compile-time constant: True at padded positions.
    mask = jnp.broadcast_to(jnp.arange(max_len) >= length, (B, max_len))
    return x_new, mask


def pad_trunc_seq(x, max_len: int = 50, keep_ori: bool = False):
    """JAX/Pallas equivalent of Pad_trunc_seq.forward for one (L, *rest) sequence."""
    length = x.shape[0]

    if keep_ori:
        # keep_ori branch is pure glue: identity + all-False mask of shape (length,).
        return x, jnp.zeros((length,), dtype=jnp.bool_)

    rest = x.shape[1:]
    d = int(math.prod(rest)) if rest else 1
    x3 = x.reshape(1, length, d)
    out_b, _ = pad_trunc_seq_batch(x3, max_len=max_len)
    x_new = out_b[0].reshape((max_len,) + rest)
    mask = jnp.arange(max_len) >= length
    return x_new, mask


# ----------------------------------------------------------------------------
# Reference + tests
# ----------------------------------------------------------------------------
def _reference(x, max_len, keep_ori=False):
    """Pure-jnp reference mirroring the PyTorch forward."""
    length = x.shape[0]
    if keep_ori:
        return x, jnp.zeros((length,), dtype=jnp.bool_)
    mask = jnp.arange(max_len) >= length
    if length < max_len:
        pad = jnp.zeros((max_len - length,) + x.shape[1:], dtype=jnp.float32)
        x_new = jnp.concatenate([x.astype(jnp.float32), pad], axis=0)
    else:
        x_new = x[:max_len].astype(jnp.float32)
    return x_new, mask


if __name__ == "__main__":
    key = jax.random.PRNGKey(0)
    max_len = 12

    # Case 1: padding (length < max_len)
    x_pad = jax.random.normal(key, (8, 16), dtype=jnp.float32)
    out_pad, mask_pad = pad_trunc_seq(x_pad, max_len=max_len, keep_ori=False)
    jax.block_until_ready((out_pad, mask_pad))
    ref_pad, ref_mask_pad = _reference(x_pad, max_len)
    assert out_pad.shape == (max_len, 16) and out_pad.dtype == jnp.float32
    assert mask_pad.shape == (max_len,) and mask_pad.dtype == jnp.bool_
    assert jnp.allclose(out_pad, ref_pad)
    assert jnp.array_equal(mask_pad, ref_mask_pad)

    # Case 2: truncation (length > max_len)
    key2 = jax.random.PRNGKey(1)
    x_trunc = jax.random.normal(key2, (16, 16), dtype=jnp.float32)
    out_tr, mask_tr = pad_trunc_seq(x_trunc, max_len=max_len, keep_ori=False)
    jax.block_until_ready((out_tr, mask_tr))
    ref_tr, ref_mask_tr = _reference(x_trunc, max_len)
    assert jnp.allclose(out_tr, ref_tr)
    assert jnp.array_equal(mask_tr, ref_mask_tr)

    # Case 3: keep_ori=True (identity + all-False mask)
    out_keep, mask_keep = pad_trunc_seq(x_pad, max_len=max_len, keep_ori=True)
    jax.block_until_ready((out_keep, mask_keep))
    assert jnp.allclose(out_keep, x_pad)
    assert mask_keep.shape == (8,) and not bool(mask_keep.any())

    # Case 4: in-kernel dtype cast (bf16 input -> f32 output, no wrapper astype)
    x_bf16 = jax.random.normal(key2, (8, 16), dtype=jnp.float32).astype(jnp.bfloat16)
    out_bf, mask_bf = pad_trunc_seq(x_bf16, max_len=max_len, keep_ori=False)
    jax.block_until_ready((out_bf, mask_bf))
    ref_bf, ref_mask_bf = _reference(x_bf16, max_len)
    assert out_bf.dtype == jnp.float32
    assert jnp.allclose(out_bf, ref_bf)
    assert jnp.array_equal(mask_bf, ref_mask_bf)

    # Case 5: batched, B=16 -> batch tile TB=8, grid=(2,) with a "parallel" axis
    x_batch = jax.random.normal(key, (16, 8, 16), dtype=jnp.float32)
    out_b, mask_b = pad_trunc_seq_batch(x_batch, max_len=max_len)
    jax.block_until_ready((out_b, mask_b))
    assert out_b.shape == (16, max_len, 16)
    for b in range(16):
        rb, rm = _reference(x_batch[b], max_len)
        assert jnp.allclose(out_b[b], rb)
        assert jnp.array_equal(mask_b[b], rm)

    # Case 6: batched truncation with a batch size that is not a multiple of 8
    # (falls back to one whole-batch block, grid=(1,))
    x_batch2 = jax.random.normal(key2, (2, 20, 16), dtype=jnp.float32)
    out_b2, mask_b2 = pad_trunc_seq_batch(x_batch2, max_len=max_len)
    jax.block_until_ready((out_b2, mask_b2))
    for b in range(2):
        rb, rm = _reference(x_batch2[b], max_len)
        assert jnp.allclose(out_b2[b], rb)
        assert jnp.array_equal(mask_b2[b], rm)

    print("KERNEL_OK")
</pallas_src>

<mosaic_0001>
module attributes {stable_mosaic.version = 11 : i64} {
  func.func @kernel(%arg0: i32, %arg1: memref<1x128xf32, #tpu.memory_space<vmem>>, %arg2: memref<1x192xf32, #tpu.memory_space<vmem>>) attributes {dimension_semantics = [#tpu.dimension_semantics<parallel>], iteration_bounds = array<i64: 1>, scalar_prefetch = 0 : i64, scratch_operands = 0 : i64, tpu.core_type = #tpu.core_type<tc>, window_params = [{transform_indices = @transform_0, window_bounds = array<i64: 1, 128>}, {transform_indices = @transform_1, window_bounds = array<i64: 1, 192>}]} {
    %c0 = arith.constant 0 : index
    %c0_0 = arith.constant 0 : index
    %0 = vector.load %arg1[%c0, %c0_0] : memref<1x128xf32, #tpu.memory_space<vmem>>, vector<1x128xf32>
    %c0_1 = arith.constant 0 : index
    %c0_2 = arith.constant 0 : index
    %1 = vector.load %arg2[%c0_1, %c0_2] : memref<1x192xf32, #tpu.memory_space<vmem>>, vector<1x128xf32>
    tpu.vector_store %arg2[%c0_1, %c0_2], %0 {strides = array<i32>} : memref<1x192xf32, #tpu.memory_space<vmem>>, vector<1x128xf32>,
    %cst = arith.constant 0.000000e+00 : f32
    %2 = vector.broadcast %cst : f32 to vector<1x64xf32>
    %c0_3 = arith.constant 0 : index
    %c128 = arith.constant 128 : index
    %3 = vector.load %arg2[%c0_3, %c128] : memref<1x192xf32, #tpu.memory_space<vmem>>, vector<1x64xf32>
    tpu.vector_store %arg2[%c0_3, %c128], %2 {strides = array<i32>} : memref<1x192xf32, #tpu.memory_space<vmem>>, vector<1x64xf32>,
    return
  }
  func.func @transform_0(%arg0: i32) -> (i32, i32) {
    %c0_i32 = arith.constant 0 : i32
    %c0_i32_0 = arith.constant 0 : i32
    return %arg0, %c0_i32 : i32, i32
  }
  func.func @transform_1(%arg0: i32) -> (i32, i32) {
    %c0_i32 = arith.constant 0 : i32
    %c0_i32_0 = arith.constant 0 : i32
    return %arg0, %c0_i32 : i32, i32
  }
}

</mosaic_0001>

<bundles_post_ra>
// kernel: tpu_custom_call.1
= control target key start
LH: loop header
LB: loop body
LE: loop exit
PB: predicated region body
PF: predicated region fallthrough
CT: control target
= control target key end

     0   :  { %6 = vsyncpa [#allocation3], 0  ;;  %s133_s0 = inlined_call_operand.hbm [shape: f32[1,128], index: 0, kind: input, shape index: {}]   ;;  %s134_s1 = inlined_call_operand.hbm [shape: f32[1,192], index: 1, kind: output, shape index: {}]  }
   0x1   :  { %7 = vsyncpa [#allocation4], 0  ;;  %s96_s6 = smov [#allocation2]   ;;  %s48_s10 = scalar_lea.hbm %s133_s0, 16 }
   0x2   :  { %s14_s7 = sshll.u32 %s96_s6, 4  ;;  %p49_p0 = scmp.ne.s32.totalorder %s133_s0, %s48_s10  ;;  %s15_s7 = int_to_ptr.vmem [resolvable:$true] %s14_s7 }
   0x3   :  { %p52_p1 = scmp.lt.u32.totalorder %s48_s10, %s133_s0 }
   0x5   :  { %p54_p2 = pnand %p52_p1, %p49_p0 }
   0x7   :  { %57 = shalt.err (!%p54_p2)
}
   0x8   :  { %s58_s15 = scalar_lea.vmem %s15_s7, 16  ;;  %s62_s16 = scalar_lea.vmem %s15_s7, 32 }
   0x9   :  { %p59_p3 = scmp.ne.s32.totalorder %s15_s7, %s58_s15  ;;  %p63_p4 = scmp.lt.s32.totalorder %s15_s7, %s15_s7 }
   0xa   :  { %p64_p5 = scmp.lt.s32.totalorder %s62_s16, %s58_s15 }
   0xc   :  { %p65_p6 = por %p64_p5, %p63_p4 }
   0xe   :  { %p66_p7 = pnand %p65_p6, %p59_p3 }
  0x10   :  { %69 = shalt.err (!%p66_p7)
}
  0x11   :  { %17 = dma.hbm_to_vmem [thread:$0]  %s133_s0, 16, %s15_s7, [#allocation3]  }
  0x12   :  { %92 = dma.done.wait [#allocation3], 16  }
  0x13   :  { %93 = vsyncadd [#allocation3], 4294967280  ;;  %v22_v0 = vlaneseq  ;;  %v97_v1 = vmov 0.0   ;;  %s98_s19 = smov [#allocation5]   ;;  %v21_v2 = vld [vmem:[#allocation2] sm:$0x1] }
  0x14   :  { %s36_s20 = sshll.u32 %s98_s19, 4  ;;  %s37_s20 = int_to_ptr.vmem [resolvable:$true] %s36_s20 }
  0x15   :  { %vm27_vm0 = vcmp.lt.s32.totalorder %v22_v0, 64  ;;  %vm24_vm1 = vcmp.lt.s32.totalorder %v22_v0, 128  ;;  %s70_s21 = scalar_lea.vmem %s37_s20, 32  ;;  %p75_p9 = scmp.lt.s32.totalorder %s37_s20, %s37_s20 }
  0x16   :  { %29 = vst.msk [vmem:[#allocation5 + $0x1] sm:$0x1] %vm27_vm0, %v97_v1  ;;  %p71_p8 = scmp.ne.s32.totalorder %s37_s20, %s70_s21  ;;  %p76_p10 = scmp.lt.s32.totalorder %s70_s21, %s70_s21 }
  0x17   :  { %26 = vst.msk [vmem:[#allocation5] sm:$0x1] %vm24_vm1, %v21_v2 }
  0x18   :  { %p77_p11 = por %p76_p10, %p75_p9 }
  0x1a   :  { %p78_p12 = pnand %p77_p11, %p71_p8 }
  0x1c   :  { %81 = shalt.err (!%p78_p12)
}
  0x1d   :  { %s82_s23 = scalar_lea.hbm %s134_s1, 32 }
  0x1e   :  { %p83_p13 = scmp.ne.s32.totalorder %s134_s1, %s82_s23  ;;  %p86_p0 = scmp.lt.u32.totalorder %s82_s23, %s134_s1 }
  0x20   :  { %p88_p1 = pnand %p86_p0, %p83_p13 }
  0x22   :  { %91 = shalt.err (!%p88_p1)
}
  0x23   :  { %39 = dma.vmem_to_hbm [thread:$0]  %s37_s20, 32, %s134_s1, [#allocation4]  }
  0x24   :  { %94 = dma.done.wait [#allocation4], 32  }
  0x25   :  { %95 = vsyncadd [#allocation4], 4294967264 }
  0x26   :  { %43 = vsyncpa [#allocation3], 1 }
  0x27   :  { %44 = vsyncpa [#allocation4], 1 }

</bundles_post_ra>
